<compile_context>
chip_gen: v6e
topology: v6e:2x2x1
jax: 0.10.0
libtpu: 0.0.40
codegen_flags: <defaults>
</compile_context>

<pallas_src>
import functools

import jax
import jax.numpy as jnp
from jax import lax
from jax.experimental import pallas as pl
from jax.experimental.pallas import tpu as pltpu


_LANE = 128
_SUB = 8


def _round_up(x, m):
    return (x + m - 1) // m * m


def _fused_embed_mean_kernel(idx_ref, table_ref, o_ref, *, seq, block_rows):
    """o_ref[r, :] = mean_s table_ref[idx[(base + r)*seq + s], :].

    idx_ref:   (R_pad*seq,) int32 in SMEM (scalar prefetch, flat row-major)
    table_ref: (V_pad, E_pad) float32, VMEM-resident fused table
    o_ref:     (block_rows, E_pad) float32 output block for this grid step
    """
    base = pl.program_id(0) * block_rows
    e_pad = table_ref.shape[1]
    inv_s = jnp.float32(1.0 / seq)

    def row_body(r, carry):
        def seq_body(s, acc):
            row_id = idx_ref[(base + r) * seq + s]
            # In-VMEM dynamic row gather (no HBM DMA, no wait).
            return acc + table_ref[pl.ds(row_id, 1), :]

        acc = lax.fori_loop(0, seq, seq_body,
                            jnp.zeros((1, e_pad), jnp.float32),
                            unroll=True)
        o_ref[pl.ds(r, 1), :] = acc * inv_s
        return carry

    lax.fori_loop(0, block_rows, row_body, 0)


def fused_embedding_mean(ids, table, *, block_rows=None):
    """out[r, :] = mean_s table[ids[r, s], :].

    ids:   (R, S) int32, already clamped/offset into `table`'s rows.
    table: (V, E) float32.
    Returns (R, E) float32.
    """
    R, S = ids.shape
    V, E = table.shape

    e_pad = _round_up(E, _LANE)   # lane-dense compute & stores
    v_pad = _round_up(V, _SUB)    # tile-aligned resident table

    if block_rows is None:
        block_rows = min(64, _round_up(R, _SUB))
    block_rows = _round_up(block_rows, _SUB)
    r_pad = _round_up(R, block_rows)

    # VMEM budget: resident table is double-buffered by the pipeline even
    # though its block never changes; keep the total conservative for v7x
    # (64 MiB physical VMEM) as well as v5e/v6e (128 MiB).
    table_bytes = 2 * v_pad * e_pad * 4
    out_bytes = 2 * block_rows * e_pad * 4
    need = table_bytes + out_bytes + (2 << 20)
    budget = 40 << 20
    if need > budget:
        # TODO(synk): manual double-buffered HBM row-gather kernel for tables
        # that do not fit in VMEM; plain XLA gather+mean fallback for now.
        return jnp.take(table, ids, axis=0).mean(axis=1)

    table_p = jnp.zeros((v_pad, e_pad), jnp.float32).at[:V, :E].set(table)
    ids_flat = jnp.zeros((r_pad * S,), jnp.int32).at[: R * S].set(
        ids.astype(jnp.int32).reshape(-1))

    kernel = functools.partial(_fused_embed_mean_kernel,
                               seq=S, block_rows=block_rows)

    grid_spec = pltpu.PrefetchScalarGridSpec(
        num_scalar_prefetch=1,
        grid=(r_pad // block_rows,),
        # Fused table: constant block index -> DMA'd once, stays resident.
        in_specs=[pl.BlockSpec((v_pad, e_pad), lambda i, ids_ref: (0, 0))],
        out_specs=pl.BlockSpec((block_rows, e_pad), lambda i, ids_ref: (i, 0)),
    )

    cost = pl.CostEstimate(
        flops=r_pad * S * e_pad,
        transcendentals=0,
        bytes_accessed=v_pad * e_pad * 4 + r_pad * S * 4 + r_pad * e_pad * 4,
    )

    out = pl.pallas_call(
        kernel,
        out_shape=jax.ShapeDtypeStruct((r_pad, e_pad), jnp.float32),
        grid_spec=grid_spec,
        compiler_params=pltpu.CompilerParams(
            # No cross-step state -> row-block axis can be split across the two
            # TensorCores on v7x.
            dimension_semantics=("parallel",),
            vmem_limit_bytes=int(min(max(need + (4 << 20), 32 << 20), budget)),
        ),
        cost_estimate=cost,
    )(ids_flat, table_p)

    return out[:R, :E]


class EmbeddingUnitLayer:
    """JAX analogue of torch EmbeddingUnitLayer (Embedding + mean over dim=1)."""

    def __init__(self, features_size, embedding_size, key):
        # torch.nn.init.normal_(weight, std=0.0001)
        self.weight = 0.0001 * jax.random.normal(
            key, (features_size, embedding_size), dtype=jnp.float32)

    def __call__(self, X, meaning=True):
        V = self.weight.shape[0]
        # torch.nn.Embedding raises on out-of-range ids; we clamp so a bad id
        # can never index out of the table (may mask upstream data bugs).
        ids = jnp.clip(X.astype(jnp.int32), 0, V - 1)
        if meaning:
            return fused_embedding_mean(ids, self.weight)
        # TODO(synk): meaning=False path (raw (B, S, E) gather) is unused by
        # EmbeddingLayer.forward; plain JAX gather fallback.
        return jnp.take(self.weight, ids, axis=0)


class EmbeddingLayer:
    """JAX analogue of the torch EmbeddingLayer module.

    All features (including ones sharing tables) are served by ONE fused
    pallas_call against a single row-stacked fused table.
    """

    def __init__(self, features, embedding_size, key):
        self.features = features
        self.embedding_size = embedding_size
        self.feature_embedding = {}
        for name, feature in self.features.items():
            if feature["shared_embed_name"] is not None:
                continue
            key, sub = jax.random.split(key)
            self.feature_embedding[name] = EmbeddingUnitLayer(
                len(feature["vocab"]), embedding_size, sub)

    def __call__(self, **kwargs):
        # Stack all distinct tables row-wise and record per-table row offsets.
        owners = list(self.feature_embedding.keys())
        offsets, tables, off = {}, [], 0
        for owner in owners:
            w = self.feature_embedding[owner].weight
            offsets[owner] = off
            off += w.shape[0]
            tables.append(w)
        fused_table = jnp.concatenate(tables, axis=0)          # (V_total, E)

        # Stack every feature's ids (offset into the fused table).
        names = list(self.features.keys())
        ids_list, batch = [], None
        for name in names:
            feature = self.features[name]
            owner = feature["shared_embed_name"] or name
            vocab = self.feature_embedding[owner].weight.shape[0]
            x = kwargs[name].astype(jnp.int32)
            if batch is None:
                batch = x.shape[0]
            x = jnp.clip(x, 0, vocab - 1) + offsets[owner]
            ids_list.append(x)
        ids_all = jnp.concatenate(ids_list, axis=0)             # (F*B, S)

        out_all = fused_embedding_mean(ids_all, fused_table)    # (F*B, E)

        # Preserve the original feature ordering.
        return {name: out_all[i * batch:(i + 1) * batch]
                for i, name in enumerate(names)}


if __name__ == "__main__":
    key = jax.random.PRNGKey(0)

    # Small synthetic feature schema (one shared-embedding feature).
    features = {
        "user_id": {"vocab": list(range(32)), "shared_embed_name": None},
        "item_id": {"vocab": list(range(48)), "shared_embed_name": None},
        "item_id_hist": {"vocab": list(range(48)), "shared_embed_name": "item_id"},
    }
    embedding_size = 16
    batch, seq = 2, 8

    key, k_params, k_u, k_i, k_h = jax.random.split(key, 5)
    layer = EmbeddingLayer(features, embedding_size, k_params)

    inputs = {
        "user_id": jax.random.randint(k_u, (batch, seq), 0, 32, dtype=jnp.int32),
        "item_id": jax.random.randint(k_i, (batch, seq), 0, 48, dtype=jnp.int32),
        "item_id_hist": jax.random.randint(k_h, (batch, seq), 0, 48, dtype=jnp.int32),
    }

    outputs = layer(**inputs)
    outputs = jax.block_until_ready(outputs)

    # Pure-JAX reference check (embedding gather + mean over seq).
    ok = True
    for name, feature in features.items():
        shared = feature["shared_embed_name"]
        table = layer.feature_embedding[shared or name].weight
        ref = jnp.take(table, inputs[name], axis=0).mean(axis=1)
        got = outputs[name]
        ok &= got.shape == (batch, embedding_size)
        ok &= bool(jnp.allclose(got, ref, atol=1e-6, rtol=1e-5))

    print("KERNEL_OK" if ok else "MISMATCH")
</pallas_src>

<mosaic_0001>
module attributes {stable_mosaic.version = 11 : i64} {
  func.func @_fused_embed_mean_kernel(%arg0: i32, %arg1: memref<64xi32, #tpu.memory_space<smem>>, %arg2: memref<80x128xf32, #tpu.memory_space<vmem>>, %arg3: memref<8x128xf32, #tpu.memory_space<vmem>>) attributes {dimension_semantics = [#tpu.dimension_semantics<parallel>], iteration_bounds = array<i64: 1>, scalar_prefetch = 1 : i64, scratch_operands = 0 : i64, tpu.core_type = #tpu.core_type<tc>, window_params = [{pipeline_mode = #tpu.pipeline_mode<synchronous>, transform_indices = @transform_0, window_bounds = array<i64: 80, 128>}, {transform_indices = @transform_1, window_bounds = array<i64: 8, 128>}]} {
    %c8_i32 = arith.constant 8 : i32
    %0 = arith.muli %arg0, %c8_i32 : i32
    %cst = arith.constant 1.250000e-01 : f32
    %c0_i32 = arith.constant 0 : i32
    %c8_i32_0 = arith.constant 8 : i32
    %1 = arith.addi %c0_i32, %c8_i32_0 : i32
    %c1_i32 = arith.constant 1 : i32
    scf.for %arg4 = %c0_i32 to %1 step %c1_i32  : i32 {
      %cst_2 = arith.constant 0.000000e+00 : f32
      %2 = vector.broadcast %cst_2 : f32 to vector<1x128xf32>
      %c0_i32_3 = arith.constant 0 : i32
      %3 = arith.addi %0, %arg4 : i32
      %c8_i32_4 = arith.constant 8 : i32
      %4 = arith.muli %3, %c8_i32_4 : i32
      %5 = arith.addi %4, %c0_i32_3 : i32
      %6 = arith.index_cast %5 : i32 to index
      %7 = memref.load %arg1[%6] : memref<64xi32, #tpu.memory_space<smem>>
      %8 = arith.index_cast %7 : i32 to index
      %c0 = arith.constant 0 : index
      %9 = vector.load %arg2[%8, %c0] : memref<80x128xf32, #tpu.memory_space<vmem>>, vector<1x128xf32>
      %10 = arith.addf %2, %9 : vector<1x128xf32>
      %c1_i32_5 = arith.constant 1 : i32
      %11 = arith.addi %0, %arg4 : i32
      %c8_i32_6 = arith.constant 8 : i32
      %12 = arith.muli %11, %c8_i32_6 : i32
      %13 = arith.addi %12, %c1_i32_5 : i32
      %14 = arith.index_cast %13 : i32 to index
      %15 = memref.load %arg1[%14] : memref<64xi32, #tpu.memory_space<smem>>
      %16 = arith.index_cast %15 : i32 to index
      %c0_7 = arith.constant 0 : index
      %17 = vector.load %arg2[%16, %c0_7] : memref<80x128xf32, #tpu.memory_space<vmem>>, vector<1x128xf32>
      %18 = arith.addf %10, %17 : vector<1x128xf32>
      %c2_i32 = arith.constant 2 : i32
      %19 = arith.addi %0, %arg4 : i32
      %c8_i32_8 = arith.constant 8 : i32
      %20 = arith.muli %19, %c8_i32_8 : i32
      %21 = arith.addi %20, %c2_i32 : i32
      %22 = arith.index_cast %21 : i32 to index
      %23 = memref.load %arg1[%22] : memref<64xi32, #tpu.memory_space<smem>>
      %24 = arith.index_cast %23 : i32 to index
      %c0_9 = arith.constant 0 : index
      %25 = vector.load %arg2[%24, %c0_9] : memref<80x128xf32, #tpu.memory_space<vmem>>, vector<1x128xf32>
      %26 = arith.addf %18, %25 : vector<1x128xf32>
      %c3_i32 = arith.constant 3 : i32
      %27 = arith.addi %0, %arg4 : i32
      %c8_i32_10 = arith.constant 8 : i32
      %28 = arith.muli %27, %c8_i32_10 : i32
      %29 = arith.addi %28, %c3_i32 : i32
      %30 = arith.index_cast %29 : i32 to index
      %31 = memref.load %arg1[%30] : memref<64xi32, #tpu.memory_space<smem>>
      %32 = arith.index_cast %31 : i32 to index
      %c0_11 = arith.constant 0 : index
      %33 = vector.load %arg2[%32, %c0_11] : memref<80x128xf32, #tpu.memory_space<vmem>>, vector<1x128xf32>
      %34 = arith.addf %26, %33 : vector<1x128xf32>
      %c4_i32 = arith.constant 4 : i32
      %35 = arith.addi %0, %arg4 : i32
      %c8_i32_12 = arith.constant 8 : i32
      %36 = arith.muli %35, %c8_i32_12 : i32
      %37 = arith.addi %36, %c4_i32 : i32
      %38 = arith.index_cast %37 : i32 to index
      %39 = memref.load %arg1[%38] : memref<64xi32, #tpu.memory_space<smem>>
      %40 = arith.index_cast %39 : i32 to index
      %c0_13 = arith.constant 0 : index
      %41 = vector.load %arg2[%40, %c0_13] : memref<80x128xf32, #tpu.memory_space<vmem>>, vector<1x128xf32>
      %42 = arith.addf %34, %41 : vector<1x128xf32>
      %c5_i32 = arith.constant 5 : i32
      %43 = arith.addi %0, %arg4 : i32
      %c8_i32_14 = arith.constant 8 : i32
      %44 = arith.muli %43, %c8_i32_14 : i32
      %45 = arith.addi %44, %c5_i32 : i32
      %46 = arith.index_cast %45 : i32 to index
      %47 = memref.load %arg1[%46] : memref<64xi32, #tpu.memory_space<smem>>
      %48 = arith.index_cast %47 : i32 to index
      %c0_15 = arith.constant 0 : index
      %49 = vector.load %arg2[%48, %c0_15] : memref<80x128xf32, #tpu.memory_space<vmem>>, vector<1x128xf32>
      %50 = arith.addf %42, %49 : vector<1x128xf32>
      %c6_i32 = arith.constant 6 : i32
      %51 = arith.addi %0, %arg4 : i32
      %c8_i32_16 = arith.constant 8 : i32
      %52 = arith.muli %51, %c8_i32_16 : i32
      %53 = arith.addi %52, %c6_i32 : i32
      %54 = arith.index_cast %53 : i32 to index
      %55 = memref.load %arg1[%54] : memref<64xi32, #tpu.memory_space<smem>>
      %56 = arith.index_cast %55 : i32 to index
      %c0_17 = arith.constant 0 : index
      %57 = vector.load %arg2[%56, %c0_17] : memref<80x128xf32, #tpu.memory_space<vmem>>, vector<1x128xf32>
      %58 = arith.addf %50, %57 : vector<1x128xf32>
      %c7_i32 = arith.constant 7 : i32
      %59 = arith.addi %0, %arg4 : i32
      %c8_i32_18 = arith.constant 8 : i32
      %60 = arith.muli %59, %c8_i32_18 : i32
      %61 = arith.addi %60, %c7_i32 : i32
      %62 = arith.index_cast %61 : i32 to index
      %63 = memref.load %arg1[%62] : memref<64xi32, #tpu.memory_space<smem>>
      %64 = arith.index_cast %63 : i32 to index
      %c0_19 = arith.constant 0 : index
      %65 = vector.load %arg2[%64, %c0_19] : memref<80x128xf32, #tpu.memory_space<vmem>>, vector<1x128xf32>
      %66 = arith.addf %58, %65 : vector<1x128xf32>
      %c8_i32_20 = arith.constant 8 : i32
      %67 = vector.broadcast %cst : f32 to vector<1x128xf32>
      %68 = arith.mulf %66, %67 : vector<1x128xf32>
      %69 = arith.index_cast %arg4 : i32 to index
      %c0_21 = arith.constant 0 : index
      %70 = vector.load %arg3[%69, %c0_21] : memref<8x128xf32, #tpu.memory_space<vmem>>, vector<1x128xf32>
      tpu.vector_store %arg3[%69, %c0_21], %68 {strides = array<i32>} : memref<8x128xf32, #tpu.memory_space<vmem>>, vector<1x128xf32>,
    }
    %c8_i32_1 = arith.constant 8 : i32
    return
  }
  func.func @transform_0(%arg0: i32, %arg1: memref<64xi32, #tpu.memory_space<smem>>) -> (i32, i32) {
    %c0_i32 = arith.constant 0 : i32
    %c0_i32_0 = arith.constant 0 : i32
    %c0_i32_1 = arith.constant 0 : i32
    return %c0_i32, %c0_i32_0 : i32, i32
  }
  func.func @transform_1(%arg0: i32, %arg1: memref<64xi32, #tpu.memory_space<smem>>) -> (i32, i32) {
    %c0_i32 = arith.constant 0 : i32
    %c0_i32_0 = arith.constant 0 : i32
    return %arg0, %c0_i32 : i32, i32
  }
}

</mosaic_0001>

<bundles_post_ra>
// kernel: tpu_custom_call.1
= control target key start
LH: loop header
LB: loop body
LE: loop exit
PB: predicated region body
PF: predicated region fallthrough
CT: control target
= control target key end

     0   :  { %s184_s9 = smov [#allocation3]   ;;  %s223_s0 = inlined_call_operand.hbm [shape: s32[64], index: 0, kind: input, shape index: {}]   ;;  %s224_s1 = inlined_call_operand.hbm [shape: f32[80,128], index: 1, kind: input, shape index: {}]   ;;  %s225_s2 = inlined_call_operand.hbm [shape: f32[8,128], index: 2, kind: output, shape index: {}]  }
   0x1   :  { %8 = dma.hbm_to_smem %s223_s0, 16, %s184_s9, [#allocation2] }
   0x2   :  { %174 = dma.done.wait [#allocation2], 16 }
   0x3   :  { %175 = vsyncadd [#allocation2], 4294967280 }
   0x4   :  { %10 = sfence }
   0x5   :  { %11 = vsyncpa [#allocation5], 0 }
   0x6   :  { %12 = vsyncpa [#allocation6], 0  ;;  %s185_s12 = smov [#allocation4]  }
   0x7   :  { %s18_s13 = sshll.u32 %s185_s12, 4  ;;  %s19_s13 = int_to_ptr.vmem [resolvable:$true] %s18_s13 }
   0x8   :  { %s138_s14 = scalar_lea.vmem %s19_s13, 1280  ;;  %p143_p1 = scmp.lt.s32.totalorder %s19_s13, %s19_s13 }
   0x9   :  { %p139_p0 = scmp.ne.s32.totalorder %s19_s13, %s138_s14  ;;  %p144_p2 = scmp.lt.s32.totalorder %s138_s14, %s138_s14 }
   0xb   :  { %p145_p3 = por %p144_p2, %p143_p1 }
   0xd   :  { %p146_p4 = pnand %p145_p3, %p139_p0 }
   0xf   :  { %149 = shalt.err (!%p146_p4)
}
  0x10   :  { %s186_s15 = smov 128   ;;  %s187_s16 = smov 8  }
  0x11   :  { %24 = dma.hbm_to_vmem [thread:$0]  %s224_s1, 1280, %s19_s13, [#allocation5], %s186_s15, %s186_s15, %s187_s16  }
  0x12   :  { %176 = dma.done.wait [#allocation5], 1280  }
  0x13   :  { %177 = vsyncadd [#allocation5], 4294966016  ;;  %s210_s0 = smov 0  }
  0x14 LB: > { %s108_s19 = sshll.u32 %s182_s0, 3  ;;  %s77_s14 = scalar_lea.vmem [#allocation7], %s182_s0  ;;  %s182_s0 = sphi %s210_s0, %s34_s0  }
  0x15   : > { %s37_s20 = sld [smem:[#allocation3 + %s108_s19]]  ;;  %s41_s21 = sadd.s32 1, %s108_s19 }
  0x16   : > { %s42_s22 = sld [smem:[#allocation3 + %s41_s21]]  ;;  %s46_s23 = sadd.s32 2, %s108_s19 }
  0x17   : > { %s47_s24 = sld [smem:[#allocation3 + %s46_s23]]  ;;  %s51_s25 = sadd.s32 3, %s108_s19 }
  0x18   : > { %s52_s26 = sld [smem:[#allocation3 + %s51_s25]]  ;;  %s56_s27 = sadd.s32 4, %s108_s19 }
  0x19   : > { %s57_s1 = sld [smem:[#allocation3 + %s56_s27]]  ;;  %s61_s28 = sadd.s32 5, %s108_s19 }
  0x1a   : > { %s62_s29 = sld [smem:[#allocation3 + %s61_s28]]  ;;  %s66_s30 = sadd.s32 6, %s108_s19 }
  0x1b   : > { %s67_s3 = sld [smem:[#allocation3 + %s66_s30]]  ;;  %s38_s4 = scalar_lea.vmem [#allocation4], %s37_s20 }
  0x1c   : > { %v39_v0 = vld [vmem:[%s38_s4] sm:$0x1]  ;;  %s71_s5 = sadd.s32 7, %s108_s19  ;;  %s43_s6 = scalar_lea.vmem [#allocation4], %s42_s22 }
  0x1d   : > { %v44_v1 = vld [vmem:[%s43_s6] sm:$0x1]  ;;  %s72_s7 = sld [smem:[#allocation3 + %s71_s5]]  ;;  %s48_s8 = scalar_lea.vmem [#allocation4], %s47_s24 }
  0x1e   : > { %v45_v2 = vadd.f32 %v44_v1, %v39_v0  ;;  %v49_v3 = vld [vmem:[%s48_s8] sm:$0x1]  ;;  %s53_s9 = scalar_lea.vmem [#allocation4], %s52_s26  ;;  %s34_s0 = sadd.s32 1, %s182_s0  }
  0x1f   : > { %v54_v4 = vld [vmem:[%s53_s9] sm:$0x1]  ;;  %s58_s10 = scalar_lea.vmem [#allocation4], %s57_s1  ;;  %p31_p5 = scmp.ge.s32.totalorder %s34_s0, 8  }
  0x20   : > { %v50_v5 = vadd.f32 %v49_v3, %v45_v2  ;;  %v59_v6 = vld [vmem:[%s58_s10] sm:$0x1]  ;;  %s63_s11 = scalar_lea.vmem [#allocation4], %s62_s29  ;;  %s188_s15 = smov (%p31_p5), [#allocation7]  }
  0x21   : > { %v64_v8 = vld [vmem:[%s63_s11] sm:$0x1]  ;;  %s68_s12 = scalar_lea.vmem [#allocation4], %s67_s3  ;;  %s85_s16 = sshll.u32 (%p31_p5), %s188_s15, 4  ;;  %s86_s16 = int_to_ptr.vmem [resolvable:$true] %s85_s16 }
  0x22   : > { %v55_v7 = vadd.f32 %v54_v4, %v50_v5  ;;  %v69_v10 = vld [vmem:[%s68_s12] sm:$0x1]  ;;  %s150_s17 = scalar_lea.vmem (%p31_p5), %s86_s16, 128  ;;  %p155_p7 = scmp.lt.s32.totalorder (%p31_p5), %s86_s16, %s86_s16 }
  0x23   : > { %s73_s13 = scalar_lea.vmem [#allocation4], %s72_s7  ;;  %p151_p6 = scmp.ne.s32.totalorder (%p31_p5), %s86_s16, %s150_s17 }
  0x24   : > { %v60_v9 = vadd.f32 %v59_v6, %v55_v7  ;;  %v74_v12 = vld [vmem:[%s73_s13] sm:$0x1]  ;;  %p156_p8 = scmp.lt.s32.totalorder (%p31_p5), %s150_s17, %s150_s17 }
  0x26   : > { %v65_v11 = vadd.f32 %v64_v8, %v60_v9  ;;  %p157_p9 = por (%p31_p5), %p156_p8, %p155_p7 }
  0x28   : > { %v70_v13 = vadd.f32 %v69_v10, %v65_v11  ;;  %p158_p10 = pnand (%p31_p5), %p157_p9, %p151_p6 }
  0x2a   : > { %v75_v14 = vadd.f32 %v74_v12, %v70_v13  ;;  %33 = sbr.rel (!%p31_p5) target bundleno = 20 (0x14), region = 44 }
  0x2c   : > { %v76_v15 = vmul.f32 0.125, %v75_v14 }
  0x2e   : > { %78 = vst [vmem:[%s77_s14] sm:$0x1] %v76_v15 }
  0x2f   :  { %161 = shalt.err (!%p158_p10)
}
  0x30   :  { %88 = dma.vmem_to_hbm [thread:$0]  %s86_s16, 128, %s225_s2, [#allocation6]  }
  0x31   :  { %178 = dma.done.wait [#allocation6], 128  }
  0x32   :  { %179 = vsyncadd [#allocation6], 4294967168 }
  0x33   :  { %92 = vsyncpa [#allocation5], 1 }
  0x34   :  { %93 = vsyncpa [#allocation6], 1 }

</bundles_post_ra>
